<compile_context>
chip_gen: v6e
topology: v6e:2x2x1
jax: 0.10.0
libtpu: 0.0.40
codegen_flags: <defaults>
</compile_context>

<pallas_src>
import jax
import jax.numpy as jnp
from jax.experimental import pallas as pl
from jax.experimental.pallas import tpu as pltpu

_LANE = 128
_SUBLANE = 8


# ----------------------------- Pallas kernel -------------------------------

def _pca_transform_kernel(x_ref, comp_ref, bias_ref, o_ref):
    # x_ref:    (TILE_N, D)      VMEM, streamed per grid step
    # comp_ref: (D, K_pad)       VMEM, resident (constant block index)
    # bias_ref: (1, K_pad)       VMEM, resident (= mean_ @ components_.T, padded)
    # o_ref:    (TILE_N, K_pad)  VMEM
    proj = jnp.dot(x_ref[...], comp_ref[...],
                   preferred_element_type=jnp.float32)          # MXU
    o_ref[...] = (proj - bias_ref[...]).astype(o_ref.dtype)     # VPU (N*K only)


# ------------------------------- wrapper ------------------------------------

def _round_up(x, m):
    return ((x + m - 1) // m) * m


def _pick_tile_n(n, d, k_pad, itemsize, vmem_budget=24 << 20):
    # Budget: double-buffered X tile + double-buffered output tile; comp/bias resident.
    fixed = d * k_pad * itemsize + k_pad * 4
    per_row = 2 * d * itemsize + 2 * k_pad * itemsize
    tile = max(_SUBLANE, (vmem_budget - fixed) // per_row)
    tile = min(tile, 1024, _round_up(n, _SUBLANE))   # 512-1024 rows ~ HBM roofline
    return max(_SUBLANE, (tile // _SUBLANE) * _SUBLANE)


def pca_transform(x, mean_, components_):
    """Pallas equivalent of PCA.transform / PCA.forward: (X - mean_) @ components_.T"""
    n, d = x.shape
    k, d2 = components_.shape
    assert d == d2 and mean_.shape == (1, d)

    # ---- one-time layout plumbing (plain JAX, not in the hot loop) ----
    # Pre-transpose components to (D, K) and pad K up to a multiple of 128 lanes.
    k_pad = _round_up(max(k, _LANE), _LANE)
    comp_dk = jnp.zeros((d, k_pad), x.dtype).at[:, :k].set(
        components_.T.astype(x.dtype))
    # Fold the mean into a (1, K_pad) f32 bias.
    # TODO(synk): if inputs are low-precision with large offsets, prefer explicit
    # centering inside the kernel instead of the bias fold (precision caveat).
    bias = jnp.dot(mean_.astype(jnp.float32),
                   comp_dk.astype(jnp.float32))                 # (1, K_pad) f32

    itemsize = jnp.dtype(x.dtype).itemsize
    tile_n = _pick_tile_n(n, d, k_pad, itemsize)
    n_pad = _round_up(n, tile_n)
    if n_pad != n:
        x = jnp.pad(x, ((0, n_pad - n), (0, 0)))

    grid = (n_pad // tile_n,)

    y_pad = pl.pallas_call(
        _pca_transform_kernel,
        out_shape=jax.ShapeDtypeStruct((n_pad, k_pad), x.dtype),
        grid_spec=pl.GridSpec(
            grid=grid,
            in_specs=[
                pl.BlockSpec((tile_n, d), lambda i: (i, 0)),   # X rows: streamed
                pl.BlockSpec((d, k_pad), lambda i: (0, 0)),    # components: resident
                pl.BlockSpec((1, k_pad), lambda i: (0, 0)),    # bias: resident
            ],
            out_specs=pl.BlockSpec((tile_n, k_pad), lambda i: (i, 0)),
        ),
        compiler_params=pltpu.CompilerParams(
            dimension_semantics=("parallel",),                 # 2 TCs on v7x
            vmem_limit_bytes=32 << 20,                         # safe across v5e/v6e/v7x
        ),
        cost_estimate=pl.CostEstimate(
            flops=2 * n_pad * d * k_pad,
            transcendentals=0,
            bytes_accessed=(n_pad * d + d * k_pad + n_pad * k_pad) * itemsize
                           + k_pad * 4,
        ),
    )(x, comp_dk, bias)

    return y_pad[:n, :k]


# ------------------------- fit (parameter setup, plain JAX) -----------------

def svd_flip(u, v):
    # Same semantics as the torch svd_flip: sign of the max-|.| entry per column of U.
    max_abs_cols = jnp.argmax(jnp.abs(u), axis=0)
    i = jnp.arange(u.shape[1])
    signs = jnp.sign(u[max_abs_cols, i])
    u = u * signs
    v = v * signs[:, None]
    return u, v


def pca_fit(x, n_components):
    """Deterministic 'fit' producing the buffers mean_ and components_."""
    n, d = x.shape
    if n_components is not None:
        d = min(n_components, d)
    mean_ = jnp.mean(x, axis=0, keepdims=True)            # (1, D)
    z = x - mean_
    u, s, vh = jnp.linalg.svd(z, full_matrices=False)
    u, vt = svd_flip(u, vh)
    components_ = vt[:d]                                   # (K, D)
    return mean_, components_


# ---------------------------------- main -----------------------------------

if __name__ == "__main__":
    key = jax.random.PRNGKey(0)
    N, D, K = 16, 32, 8          # small shapes: 16 samples, 32 features, 8 components

    x = jax.random.normal(key, (N, D), dtype=jnp.float32)

    # "fit" = parameter setup (glue); forward/transform = Pallas kernel.
    mean_, components_ = pca_fit(x, n_components=K)

    y = pca_transform(x, mean_, components_)
    y = jax.block_until_ready(y)

    # sanity check vs. pure-JAX reference of the same math
    y_ref = (x - mean_) @ components_.T
    assert y.shape == (N, K)
    assert jnp.allclose(y, y_ref, atol=1e-4, rtol=1e-4)

    print("KERNEL_OK")
</pallas_src>

<mosaic_0001>
module attributes {stable_mosaic.version = 11 : i64} {
  func.func @_pca_transform_kernel(%arg0: i32, %arg1: memref<16x32xf32, #tpu.memory_space<vmem>>, %arg2: memref<32x128xf32, #tpu.memory_space<vmem>>, %arg3: memref<1x128xf32, #tpu.memory_space<vmem>>, %arg4: memref<16x128xf32, #tpu.memory_space<vmem>>) attributes {dimension_semantics = [#tpu.dimension_semantics<parallel>], iteration_bounds = array<i64: 1>, scalar_prefetch = 0 : i64, scratch_operands = 0 : i64, tpu.core_type = #tpu.core_type<tc>, window_params = [{transform_indices = @transform_0, window_bounds = array<i64: 16, 32>}, {pipeline_mode = #tpu.pipeline_mode<synchronous>, transform_indices = @transform_1, window_bounds = array<i64: 32, 128>}, {pipeline_mode = #tpu.pipeline_mode<synchronous>, transform_indices = @transform_2, window_bounds = array<i64: 1, 128>}, {transform_indices = @transform_3, window_bounds = array<i64: 16, 128>}]} {
    %c0 = arith.constant 0 : index
    %c0_0 = arith.constant 0 : index
    %0 = vector.load %arg1[%c0, %c0_0] : memref<16x32xf32, #tpu.memory_space<vmem>>, vector<16x32xf32>
    %c0_1 = arith.constant 0 : index
    %c0_2 = arith.constant 0 : index
    %1 = vector.load %arg2[%c0_1, %c0_2] : memref<32x128xf32, #tpu.memory_space<vmem>>, vector<32x128xf32>
    %cst = arith.constant dense<0.000000e+00> : vector<16x128xf32>
    %2 = tpu.matmul %0, %1, %cst {dimension_numbers = #tpu.dot_dimension_numbers<[1], [0], [0], [1], [0, 0, 1, 1], [], []>} : vector<16x32xf32>, vector<32x128xf32>, vector<16x128xf32> -> vector<16x128xf32>
    %c0_3 = arith.constant 0 : index
    %c0_4 = arith.constant 0 : index
    %3 = vector.load %arg3[%c0_3, %c0_4] : memref<1x128xf32, #tpu.memory_space<vmem>>, vector<1x128xf32>
    %4 = vector.broadcast %3 : vector<1x128xf32> to vector<16x128xf32>
    %5 = arith.subf %2, %4 : vector<16x128xf32>
    %c0_5 = arith.constant 0 : index
    %c0_6 = arith.constant 0 : index
    %6 = vector.load %arg4[%c0_5, %c0_6] : memref<16x128xf32, #tpu.memory_space<vmem>>, vector<16x128xf32>
    tpu.vector_store %arg4[%c0_5, %c0_6], %5 {strides = array<i32>} : memref<16x128xf32, #tpu.memory_space<vmem>>, vector<16x128xf32>,
    return
  }
  func.func @transform_0(%arg0: i32) -> (i32, i32) {
    %c0_i32 = arith.constant 0 : i32
    %c0_i32_0 = arith.constant 0 : i32
    return %arg0, %c0_i32 : i32, i32
  }
  func.func @transform_1(%arg0: i32) -> (i32, i32) {
    %c0_i32 = arith.constant 0 : i32
    %c0_i32_0 = arith.constant 0 : i32
    %c0_i32_1 = arith.constant 0 : i32
    return %c0_i32, %c0_i32_0 : i32, i32
  }
  func.func @transform_2(%arg0: i32) -> (i32, i32) {
    %c0_i32 = arith.constant 0 : i32
    %c0_i32_0 = arith.constant 0 : i32
    %c0_i32_1 = arith.constant 0 : i32
    return %c0_i32, %c0_i32_0 : i32, i32
  }
  func.func @transform_3(%arg0: i32) -> (i32, i32) {
    %c0_i32 = arith.constant 0 : i32
    %c0_i32_0 = arith.constant 0 : i32
    return %arg0, %c0_i32 : i32, i32
  }
}

</mosaic_0001>

<bundles_post_ra>
// kernel: tpu_custom_call.1
= control target key start
LH: loop header
LB: loop body
LE: loop exit
PB: predicated region body
PF: predicated region fallthrough
CT: control target
= control target key end

     0   :  { %8 = vsyncpa [#allocation3], 0  ;;  %s299_s0 = inlined_call_operand.hbm [shape: f32[16,32], index: 0, kind: input, shape index: {}]   ;;  %s300_s1 = inlined_call_operand.hbm [shape: f32[32,128], index: 1, kind: input, shape index: {}]   ;;  %s301_s2 = inlined_call_operand.vmem [shape: f32[1,128], index: 2, kind: input, shape index: {}]   ;;  %s302_s3 = inlined_call_operand.hbm [shape: f32[16,128], index: 3, kind: output, shape index: {}]  }
   0x1   :  { %9 = vsyncpa [#allocation6], 0 }
   0x2   :  { %10 = vsyncpa [#allocation4], 0  ;;  %s251_s12 = smov [#allocation2]  }
   0x3   :  { %s16_s13 = sshll.u32 %s251_s12, 4  ;;  %s17_s13 = int_to_ptr.vmem [resolvable:$true] %s16_s13 }
   0x4   :  { %s193_s14 = scalar_lea.vmem %s17_s13, 256  ;;  %p198_p1 = scmp.lt.s32.totalorder %s17_s13, %s17_s13 }
   0x5   :  { %p194_p0 = scmp.ne.s32.totalorder %s17_s13, %s193_s14  ;;  %p199_p2 = scmp.lt.s32.totalorder %s193_s14, %s193_s14 }
   0x7   :  { %p200_p3 = por %p199_p2, %p198_p1 }
   0x9   :  { %p201_p4 = pnand %p200_p3, %p194_p0 }
   0xb   :  { %204 = shalt.err (!%p201_p4)
}
   0xc   :  { %s252_s15 = smov 128   ;;  %s253_s16 = smov 8  }
   0xd   :  { %22 = dma.hbm_to_vmem [thread:$0]  %s299_s0, 256, %s17_s13, [#allocation3], %s252_s15, %s252_s15, %s253_s16  }
   0xe   :  { %s254_s19 = smov [#allocation5]  }
   0xf   :  { %s28_s20 = sshll.u32 %s254_s19, 4  ;;  %s29_s20 = int_to_ptr.vmem [resolvable:$true] %s28_s20 }
  0x10   :  { %s213_s21 = scalar_lea.vmem %s29_s20, 512  ;;  %p218_p6 = scmp.lt.s32.totalorder %s29_s20, %s29_s20 }
  0x11   :  { %p214_p5 = scmp.ne.s32.totalorder %s29_s20, %s213_s21  ;;  %p219_p7 = scmp.lt.s32.totalorder %s213_s21, %s213_s21 }
  0x13   :  { %p220_p8 = por %p219_p7, %p218_p6 }
  0x15   :  { %p221_p9 = pnand %p220_p8, %p214_p5 }
  0x17   :  { %224 = shalt.err (!%p221_p9)
}
  0x18   :  { %34 = dma.hbm_to_vmem [thread:$0]  %s300_s1, 512, %s29_s20, [#allocation6], %s252_s15, %s252_s15, %s253_s16  }
  0x19   :  { %245 = dma.done.wait [#allocation3], 256  }
  0x1a   :  { %246 = vsyncadd [#allocation3], 4294967040 }
  0x1b   :  { %247 = dma.done.wait [#allocation6], 512  }
  0x1c   :  { %248 = vsyncadd [#allocation6], 4294966784  ;;  %vm49_vm0 = vcmask 261120   ;;  %v48_v0 = vld [vmem:[#allocation5 + $0x18] sm:$0xff]  ;;  %v47_v1 = vld [vmem:[#allocation5 + $0x10] sm:$0xff]  ;;  %s255_s24 = smov [#allocation7]  }
  0x1d   :  { %169 = vmatprep.subr.mxu0 %v48_v0  ;;  %v43_v2 = vld [vmem:[#allocation2] sm:$0xff]  ;;  %v46_v3 = vld [vmem:[#allocation5 + $0x8] sm:$0xff]  ;;  %v45_v4 = vld [vmem:[#allocation5] sm:$0xff]  ;;  %s147_s25 = sshll.u32 %s255_s24, 4  ;;  %s148_s25 = int_to_ptr.vmem [resolvable:$true] %s147_s25 }
  0x1e   :  { %170 = vmatpush3.msra.mxu0 %v48_v0  ;;  %177 = vmatprep.mubr.msk.f32.mxu0 %vm49_vm0, %v43_v2  ;;  %v44_v5 = vld [vmem:[#allocation2 + $0x8] sm:$0xff]  ;;  %v162_v6 = vld [vmem:[%s301_s2] ss:$0 sm:$0xff]  ;;  %s225_s26 = scalar_lea.vmem %s148_s25, 256  ;;  %p230_p11 = scmp.lt.s32.totalorder %s148_s25, %s148_s25 }
  0x1f   :  { %171 = vmatprep.subr.mxu0 %v47_v1  ;;  %p226_p10 = scmp.ne.s32.totalorder %s148_s25, %s225_s26  ;;  %p231_p12 = scmp.lt.s32.totalorder %s225_s26, %s225_s26 }
  0x20   :  { %172 = vmatpush3.msra.mxu0 %v47_v1 }
  0x21   :  { %173 = vmatprep.subr.mxu0 %v46_v3  ;;  %p232_p13 = por %p231_p12, %p230_p11 }
  0x22   :  { %174 = vmatpush3.msra.mxu0 %v46_v3 }
  0x23   :  { %175 = vmatprep.subr.mxu0 %v45_v4  ;;  %p233_p0 = pnand %p232_p13, %p226_p10 }
  0x24   :  { %176 = vmatpush3.msra.mxu0 %v45_v4 }
  0x25   :  { %178 = vmatmul.mubr.msk.f32.vlgmr.msra.gmra.mxu0 %vm49_vm0, %v44_v5 }
  0xe5   :  { %v179_v7 = vpop.f32.mrf.mxu0 }
  0xe6   :  { %v139_v8 = vsub.f32 %v179_v7, %v162_v6 }
  0xe7   :  { %v122_v9 = vpop.f32.mrf.mxu0 }
  0xe8   :  { %141 = vst [vmem:[#allocation7 + $0x8] sm:$0xff] %v139_v8  ;;  %v138_v10 = vsub.f32 %v122_v9, %v162_v6 }
  0xea   :  { %140 = vst [vmem:[#allocation7] sm:$0xff] %v138_v10 }
  0xeb   :  { %236 = shalt.err (!%p233_p0)
}
  0xec   :  { %153 = dma.vmem_to_hbm [thread:$0]  %s148_s25, 256, %s302_s3, [#allocation4], %s252_s15, %s252_s15, %s253_s16  }
  0xed   :  { %249 = dma.done.wait [#allocation4], 256  }
  0xee   :  { %250 = vsyncadd [#allocation4], 4294967040 }
  0xef   :  { %157 = vsyncpa [#allocation3], 1 }
  0xf0   :  { %158 = vsyncpa [#allocation6], 1 }
  0xf1   :  { %159 = vsyncpa [#allocation4], 1 }

</bundles_post_ra>
